<compile_context>
chip_gen: v6e
topology: v6e:2x2x1
jax: 0.10.0
libtpu: 0.0.40
codegen_flags: <defaults>
</compile_context>

<pallas_src>
import math
from typing import NamedTuple

import jax
import jax.numpy as jnp
from jax.experimental import pallas as pl
from jax.experimental.pallas import tpu as pltpu


_RPAD = 128  # LoRA rank zero-padded to one lane group (zeros -> exact result)


# ----------------------------------------------------------------------------
# Pallas kernel: tiled base matmul + bias + precomputed rank-r LoRA epilogue
# ----------------------------------------------------------------------------
def _lora_kernel(x_ref, w_ref, b_ref, d_ref, wu_ref, o_ref, acc_ref):
    """One (tm, tn) output tile, reduced over the k grid axis.

    x_ref  : (tm, tk)    bf16  activation tile
    w_ref  : (tk, tn)    bf16  base weight tile
    b_ref  : (1,  tn)    f32   bias tile
    d_ref  : (tm, 128)   bf16  precomputed LoRA-down activation (X @ W_down)
    wu_ref : (128, tn)   bf16  W_up * multiplier * scale
    o_ref  : (tm, tn)    bf16  output tile
    acc_ref: (tm, tn)    f32   accumulator scratch (persists across k)
    """
    k = pl.program_id(2)
    nk = pl.num_programs(2)

    @pl.when(k == 0)
    def _():
        # Seed the accumulator with the broadcast bias -> no VPU add in the
        # store epilogue.
        acc_ref[...] = jnp.broadcast_to(b_ref[...], acc_ref.shape)

    acc_ref[...] += jnp.dot(x_ref[...], w_ref[...],
                            preferred_element_type=jnp.float32)

    @pl.when(k == nk - 1)
    def _():
        lora = jnp.dot(d_ref[...], wu_ref[...],
                       preferred_element_type=jnp.float32)
        o_ref[...] = (acc_ref[...] + lora).astype(o_ref.dtype)


# ----------------------------------------------------------------------------
# Tiling / padding helpers
# ----------------------------------------------------------------------------
def _round_up(x, m):
    return ((x + m - 1) // m) * m


def _pick_best(dim, candidates):
    """Largest tile among candidates minimizing padding waste."""
    best = None
    for t in candidates:  # largest first; strict '<' keeps larger on ties
        pad = _round_up(dim, t) - dim
        if best is None or pad < best[0]:
            best = (pad, t)
    return best[1]


def _pick_tm(M):
    # Multiple of 16 (full sublane packing for bf16 x tiles).
    m16 = _round_up(max(M, 16), 16)
    if m16 <= 1024:
        return m16
    return _pick_best(M, (1024, 512, 384, 256, 128))


def _pick_tn(N):
    if N <= 512:
        return _round_up(N, 128)
    return _pick_best(N, (512, 384, 256))


def _pick_tk(K):
    if K <= 512:
        return _round_up(K, 128)
    return _pick_best(K, (512, 384, 256))


def _pad2(a, rows, cols):
    r, c = a.shape
    if r == rows and c == cols:
        return a
    return jnp.pad(a, ((0, rows - r), (0, cols - c)))


def _vmem_limit_bytes(tm, tn, tk):
    """Actual double-buffered block + scratch footprint, +50% headroom."""
    dbl = 2 * (tm * tk * 2        # x (bf16)
               + tk * tn * 2      # W_org (bf16)
               + 8 * tn * 4       # bias (f32, sublane-padded)
               + tm * _RPAD * 2   # down activations (bf16)
               + _RPAD * tn * 2   # W_up * coef (bf16)
               + tm * tn * 2)     # output (bf16)
    scratch = tm * tn * 4         # f32 accumulator
    need = (dbl + scratch) * 3 // 2
    # Clamp: never below a useful minimum, never close to v7x's 64 MiB/TC.
    return int(min(max(need, 16 * 1024 * 1024), 40 * 1024 * 1024))


class _MMCfg(NamedTuple):
    k: int
    n: int
    tk: int
    tn: int


def _prep_matmul_weights(w, b, wd, wu, coef):
    """w:(K,N) b:(1,N) wd:(K,r) wu:(r,N); pad/cast once, fold coef into wu."""
    K, N = map(int, w.shape)
    tk, tn = _pick_tk(K), _pick_tn(N)
    Kp, Np = _round_up(K, tk), _round_up(N, tn)
    wp = _pad2(w, Kp, Np).astype(jnp.bfloat16)
    wdp = _pad2(wd, Kp, _RPAD).astype(jnp.bfloat16)
    wup = _pad2(wu * coef, _RPAD, Np).astype(jnp.bfloat16)
    bp = _pad2(b.astype(jnp.float32), 1, Np)
    return wp, bp, wdp, wup, _MMCfg(K, N, tk, tn)


def _lora_matmul(x2, w, b, wd, wu, cfg):
    """x2:(M,K); w/b/wd/wu pre-padded (bf16/f32-bias). Returns (M,N) bf16."""
    M = int(x2.shape[0])
    Kp, Np = map(int, w.shape)
    tm, tn, tk = _pick_tm(M), cfg.tn, cfg.tk
    Mp = _round_up(M, tm)

    # bf16 before padding -> pad/convert is one half-width pass (fused by XLA).
    xp = _pad2(x2.astype(jnp.bfloat16), Mp, Kp)

    # Precompute the LoRA down projection once (thin Mp x 128 matmul, handled
    # by XLA on the MXU).  Removes W_down streaming + scratch from the kernel
    # and makes the j grid axis data-independent (-> megacore-parallel).
    down = jnp.dot(xp, wd, preferred_element_type=jnp.float32)
    down = down.astype(jnp.bfloat16)

    grid = (Mp // tm, Np // tn, Kp // tk)

    out = pl.pallas_call(
        _lora_kernel,
        out_shape=jax.ShapeDtypeStruct((Mp, Np), jnp.bfloat16),
        grid_spec=pltpu.PrefetchScalarGridSpec(
            num_scalar_prefetch=0,
            grid=grid,
            in_specs=[
                pl.BlockSpec((tm, tk), lambda i, j, k: (i, k)),       # x
                pl.BlockSpec((tk, tn), lambda i, j, k: (k, j)),       # W_org
                pl.BlockSpec((1, tn), lambda i, j, k: (0, j)),        # bias
                pl.BlockSpec((tm, _RPAD), lambda i, j, k: (i, 0)),    # down
                pl.BlockSpec((_RPAD, tn), lambda i, j, k: (0, j)),    # W_up*c
            ],
            out_specs=pl.BlockSpec((tm, tn), lambda i, j, k: (i, j)),
            scratch_shapes=[
                pltpu.VMEM((tm, tn), jnp.float32),  # base+LoRA accumulator
            ],
        ),
        compiler_params=pltpu.CompilerParams(
            # i and j are independent output tiles (accumulator is per-(i,j));
            # only k (the reduction) must stay sequential.  j parallel lets
            # v7x shard N tiles across both TensorCores even at small M.
            dimension_semantics=("parallel", "parallel", "arbitrary"),
            vmem_limit_bytes=_vmem_limit_bytes(tm, tn, tk),
        ),
        # TODO(synk): sweep pipeline_mode=pl.Buffered(3) on x / W_org if a
        # trace shows exposed DMA at memory-bound shapes.
    )(xp, w, b, down, wu)
    return out[:M, :cfg.n]


# ----------------------------------------------------------------------------
# Linear variant of LoRAModule.forward (factory = "module init")
# ----------------------------------------------------------------------------
def make_lora_linear(w_org, b_org, w_down, w_up, multiplier, scale):
    # PyTorch shapes: w_org (out,in), b_org (out,), w_down (r,in), w_up (out,r)
    wp, bp, wdp, wup, cfg = _prep_matmul_weights(
        w_org.T, b_org.reshape(1, -1), w_down.T, w_up.T, multiplier * scale)

    @jax.jit
    def _fwd(x, w, b, wd, wu):
        lead = x.shape[:-1]
        x2 = x.reshape(-1, x.shape[-1])
        out = _lora_matmul(x2, w, b, wd, wu, cfg)          # bf16
        # Cast back to the caller's activation dtype (no-op for bf16 callers).
        return out.reshape(*lead, cfg.n).astype(x.dtype)

    return lambda x: _fwd(x, wp, bp, wdp, wup)


# ----------------------------------------------------------------------------
# Conv2d variant of LoRAModule.forward (im2col glue + fused matmul kernel)
# ----------------------------------------------------------------------------
def _im2col_nhwc(x, kh, kw, stride, padding):
    # x: (N, H, W, C) -> patches (N*Ho*Wo, kh*kw*C), channel-minor per tap.
    x = jnp.pad(x, ((0, 0), (padding[0], padding[0]),
                    (padding[1], padding[1]), (0, 0)))
    N, H, W, C = x.shape
    ho = (H - kh) // stride[0] + 1
    wo = (W - kw) // stride[1] + 1
    taps = []
    for i in range(kh):
        for j in range(kw):
            taps.append(x[:, i:i + stride[0] * ho:stride[0],
                          j:j + stride[1] * wo:stride[1], :])
    patches = jnp.stack(taps, axis=3)            # (N, ho, wo, kh*kw, C)
    return patches.reshape(N * ho * wo, kh * kw * C), (N, ho, wo)


def make_lora_conv2d(w_org, b_org, w_down, w_up, multiplier, scale,
                     stride, padding):
    # PyTorch shapes: w_org (Cout,Cin,kh,kw), b_org (Cout,),
    #                 w_down (r,Cin,kh,kw), w_up (Cout,r,1,1)
    Cout, Cin, kh, kw = map(int, w_org.shape)
    r = int(w_down.shape[0])
    stride = tuple(int(s) for s in stride)
    padding = tuple(int(p) for p in padding)

    # Match the (tap-major, channel-minor) im2col patch ordering.
    wm = jnp.transpose(w_org, (2, 3, 1, 0)).reshape(kh * kw * Cin, Cout)
    wdm = jnp.transpose(w_down, (2, 3, 1, 0)).reshape(kh * kw * Cin, r)
    wum = w_up.reshape(Cout, r).T                # 1x1 conv == channel matmul
    wp, bp, wdp, wup, cfg = _prep_matmul_weights(
        wm, b_org.reshape(1, -1), wdm, wum, multiplier * scale)

    @jax.jit
    def _fwd(x_nchw, w, b, wd, wu):
        # bf16 BEFORE im2col: the kh*kw patch blow-up moves half the bytes.
        x_nhwc = jnp.transpose(x_nchw, (0, 2, 3, 1)).astype(jnp.bfloat16)
        patches, (n, ho, wo) = _im2col_nhwc(x_nhwc, kh, kw, stride, padding)
        out = _lora_matmul(patches, w, b, wd, wu, cfg)     # bf16
        out = out.reshape(n, ho, wo, cfg.n)
        out = jnp.transpose(out, (0, 3, 1, 2))             # back to NCHW
        return out.astype(x_nchw.dtype)

    return lambda x: _fwd(x, wp, bp, wdp, wup)


# ----------------------------------------------------------------------------
# Pure-JAX references (mirror the PyTorch semantics exactly, full f32)
# ----------------------------------------------------------------------------
def _ref_linear(x, w, b, wd, wu, mult, scale):
    base = x @ w.T + b
    lora = (x @ wd.T) @ wu.T
    return base + lora * mult * scale


def _ref_conv(x, w, b, wd, wu, mult, scale, stride, padding):
    dn = ("NCHW", "OIHW", "NCHW")
    pads = [(padding[0], padding[0]), (padding[1], padding[1])]
    base = jax.lax.conv_general_dilated(x, w, stride, pads,
                                        dimension_numbers=dn)
    base = base + b.reshape(1, -1, 1, 1)
    down = jax.lax.conv_general_dilated(x, wd, stride, pads,
                                        dimension_numbers=dn)
    up = jax.lax.conv_general_dilated(down, wu, (1, 1), [(0, 0), (0, 0)],
                                      dimension_numbers=dn)
    return base + up * mult * scale


if __name__ == "__main__":
    key = jax.random.PRNGKey(0)
    ks = jax.random.split(key, 12)

    multiplier = 1.0
    lora_dim = 4
    lora_alpha = 1
    scale = lora_alpha / lora_dim

    # NOTE: the module zero-inits lora_up (so LoRA starts as a no-op); here we
    # use small random weights so the LoRA path in the kernel is exercised.
    # lora_down uses kaiming_uniform(a=sqrt(5)) -> bound = 1/sqrt(fan_in).

    # ---- Linear case: wraps nn.Linear(in=32, out=64), x: (2, 8, 32) ----
    in_f, out_f = 32, 64
    x_lin = jax.random.normal(ks[0], (2, 8, in_f), jnp.float32)
    w_org_l = jax.random.normal(ks[1], (out_f, in_f), jnp.float32) * 0.1
    b_org_l = jax.random.normal(ks[2], (out_f,), jnp.float32) * 0.1
    bound_l = 1.0 / math.sqrt(in_f)
    wd_l = jax.random.uniform(ks[3], (lora_dim, in_f), jnp.float32,
                              -bound_l, bound_l)
    wu_l = jax.random.normal(ks[4], (out_f, lora_dim), jnp.float32) * 0.05

    lin_forward = make_lora_linear(w_org_l, b_org_l, wd_l, wu_l,
                                   multiplier, scale)
    out_lin = lin_forward(x_lin)
    jax.block_until_ready(out_lin)
    ref_lin = _ref_linear(x_lin, w_org_l, b_org_l, wd_l, wu_l,
                          multiplier, scale)
    assert out_lin.shape == ref_lin.shape
    # bf16 MXU inputs / bf16 output with f32 accumulation vs. full-f32 ref.
    assert jnp.allclose(out_lin, ref_lin, atol=2e-2, rtol=2e-2), (
        float(jnp.max(jnp.abs(out_lin - ref_lin))))

    # ---- Conv2d case: wraps nn.Conv2d(4, 8, 3, stride=1, padding=1) ----
    # x: (2, 4, 16, 16) NCHW (PyTorch convention)
    Cin, Cout, kh, kw = 4, 8, 3, 3
    stride, padding = (1, 1), (1, 1)
    x_conv = jax.random.normal(ks[5], (2, Cin, 16, 16), jnp.float32)
    w_org_c = jax.random.normal(ks[6], (Cout, Cin, kh, kw), jnp.float32) * 0.1
    b_org_c = jax.random.normal(ks[7], (Cout,), jnp.float32) * 0.1
    bound_c = 1.0 / math.sqrt(Cin * kh * kw)
    wd_c = jax.random.uniform(ks[8], (lora_dim, Cin, kh, kw), jnp.float32,
                              -bound_c, bound_c)
    wu_c = jax.random.normal(ks[9], (Cout, lora_dim, 1, 1), jnp.float32) * 0.05

    conv_forward = make_lora_conv2d(w_org_c, b_org_c, wd_c, wu_c,
                                    multiplier, scale, stride, padding)
    out_conv = conv_forward(x_conv)
    jax.block_until_ready(out_conv)
    ref_conv = _ref_conv(x_conv, w_org_c, b_org_c, wd_c, wu_c,
                         multiplier, scale, stride, padding)
    assert out_conv.shape == ref_conv.shape
    assert jnp.allclose(out_conv, ref_conv, atol=2e-2, rtol=2e-2), (
        float(jnp.max(jnp.abs(out_conv - ref_conv))))

    print("KERNEL_OK")
</pallas_src>

<mosaic_0001>
module attributes {stable_mosaic.version = 11 : i64} {
  func.func @_lora_kernel(%arg0: i32, %arg1: i32, %arg2: i32, %arg3: memref<16x128xbf16, #tpu.memory_space<vmem>>, %arg4: memref<128x128xbf16, #tpu.memory_space<vmem>>, %arg5: memref<1x128xf32, #tpu.memory_space<vmem>>, %arg6: memref<16x128xbf16, #tpu.memory_space<vmem>>, %arg7: memref<128x128xbf16, #tpu.memory_space<vmem>>, %arg8: memref<16x128xbf16, #tpu.memory_space<vmem>>, %arg9: memref<16x128xf32, #tpu.memory_space<vmem>>) attributes {dimension_semantics = [#tpu.dimension_semantics<parallel>, #tpu.dimension_semantics<parallel>, #tpu.dimension_semantics<arbitrary>], iteration_bounds = array<i64: 1, 1, 1>, scalar_prefetch = 0 : i64, scratch_operands = 1 : i64, tpu.core_type = #tpu.core_type<tc>, window_params = [{transform_indices = @transform_0, window_bounds = array<i64: 16, 128>}, {transform_indices = @transform_1, window_bounds = array<i64: 128, 128>}, {transform_indices = @transform_2, window_bounds = array<i64: 1, 128>}, {transform_indices = @transform_3, window_bounds = array<i64: 16, 128>}, {transform_indices = @transform_4, window_bounds = array<i64: 128, 128>}, {transform_indices = @transform_5, window_bounds = array<i64: 16, 128>}]} {
    %c0_i32 = arith.constant 0 : i32
    %0 = arith.cmpi eq, %arg2, %c0_i32 : i32
    %1 = arith.extui %0 : i1 to i32
    %c0_i32_0 = arith.constant 0 : i32
    %2 = arith.cmpi ne, %1, %c0_i32_0 : i32
    scf.if %2 {
      %c0_10 = arith.constant 0 : index
      %c0_11 = arith.constant 0 : index
      %12 = vector.load %arg5[%c0_10, %c0_11] : memref<1x128xf32, #tpu.memory_space<vmem>>, vector<1x128xf32>
      %13 = vector.shape_cast %12 : vector<1x128xf32> to vector<1x128xf32>
      %14 = vector.broadcast %13 : vector<1x128xf32> to vector<16x128xf32>
      %c0_12 = arith.constant 0 : index
      %c0_13 = arith.constant 0 : index
      %15 = vector.load %arg9[%c0_12, %c0_13] : memref<16x128xf32, #tpu.memory_space<vmem>>, vector<16x128xf32>
      tpu.vector_store %arg9[%c0_12, %c0_13], %14 {strides = array<i32>} : memref<16x128xf32, #tpu.memory_space<vmem>>, vector<16x128xf32>,
    } else {
    }
    %c0 = arith.constant 0 : index
    %c0_1 = arith.constant 0 : index
    %3 = vector.load %arg9[%c0, %c0_1] : memref<16x128xf32, #tpu.memory_space<vmem>>, vector<16x128xf32>
    %c0_2 = arith.constant 0 : index
    %c0_3 = arith.constant 0 : index
    %4 = vector.load %arg3[%c0_2, %c0_3] : memref<16x128xbf16, #tpu.memory_space<vmem>>, vector<16x128xbf16>
    %c0_4 = arith.constant 0 : index
    %c0_5 = arith.constant 0 : index
    %5 = vector.load %arg4[%c0_4, %c0_5] : memref<128x128xbf16, #tpu.memory_space<vmem>>, vector<128x128xbf16>
    %cst = arith.constant dense<0.000000e+00> : vector<16x128xf32>
    %6 = tpu.matmul %4, %5, %cst {dimension_numbers = #tpu.dot_dimension_numbers<[1], [0], [0], [1], [0, 0, 1, 1], [], []>} : vector<16x128xbf16>, vector<128x128xbf16>, vector<16x128xf32> -> vector<16x128xf32>
    %7 = arith.addf %3, %6 : vector<16x128xf32>
    %c0_6 = arith.constant 0 : index
    %c0_7 = arith.constant 0 : index
    %8 = vector.load %arg9[%c0_6, %c0_7] : memref<16x128xf32, #tpu.memory_space<vmem>>, vector<16x128xf32>
    tpu.vector_store %arg9[%c0_6, %c0_7], %7 {strides = array<i32>} : memref<16x128xf32, #tpu.memory_space<vmem>>, vector<16x128xf32>,
    %c0_i32_8 = arith.constant 0 : i32
    %9 = arith.cmpi eq, %arg2, %c0_i32_8 : i32
    %10 = arith.extui %9 : i1 to i32
    %c0_i32_9 = arith.constant 0 : i32
    %11 = arith.cmpi ne, %10, %c0_i32_9 : i32
    scf.if %11 {
      %c0_10 = arith.constant 0 : index
      %c0_11 = arith.constant 0 : index
      %12 = vector.load %arg6[%c0_10, %c0_11] : memref<16x128xbf16, #tpu.memory_space<vmem>>, vector<16x128xbf16>
      %c0_12 = arith.constant 0 : index
      %c0_13 = arith.constant 0 : index
      %13 = vector.load %arg7[%c0_12, %c0_13] : memref<128x128xbf16, #tpu.memory_space<vmem>>, vector<128x128xbf16>
      %cst_14 = arith.constant dense<0.000000e+00> : vector<16x128xf32>
      %14 = tpu.matmul %12, %13, %cst_14 {dimension_numbers = #tpu.dot_dimension_numbers<[1], [0], [0], [1], [0, 0, 1, 1], [], []>} : vector<16x128xbf16>, vector<128x128xbf16>, vector<16x128xf32> -> vector<16x128xf32>
      %c0_15 = arith.constant 0 : index
      %c0_16 = arith.constant 0 : index
      %15 = vector.load %arg9[%c0_15, %c0_16] : memref<16x128xf32, #tpu.memory_space<vmem>>, vector<16x128xf32>
      %16 = arith.addf %15, %14 : vector<16x128xf32>
      %17 = arith.truncf %16 : vector<16x128xf32> to vector<16x128xbf16>
      %c0_17 = arith.constant 0 : index
      %c0_18 = arith.constant 0 : index
      %18 = vector.load %arg8[%c0_17, %c0_18] : memref<16x128xbf16, #tpu.memory_space<vmem>>, vector<16x128xbf16>
      tpu.vector_store %arg8[%c0_17, %c0_18], %17 {strides = array<i32>} : memref<16x128xbf16, #tpu.memory_space<vmem>>, vector<16x128xbf16>,
    } else {
    }
    return
  }
  func.func @transform_0(%arg0: i32, %arg1: i32, %arg2: i32) -> (i32, i32) {
    %c0_i32 = arith.constant 0 : i32
    return %arg0, %arg2 : i32, i32
  }
  func.func @transform_1(%arg0: i32, %arg1: i32, %arg2: i32) -> (i32, i32) {
    %c0_i32 = arith.constant 0 : i32
    return %arg2, %arg1 : i32, i32
  }
  func.func @transform_2(%arg0: i32, %arg1: i32, %arg2: i32) -> (i32, i32) {
    %c0_i32 = arith.constant 0 : i32
    %c0_i32_0 = arith.constant 0 : i32
    return %c0_i32, %arg1 : i32, i32
  }
  func.func @transform_3(%arg0: i32, %arg1: i32, %arg2: i32) -> (i32, i32) {
    %c0_i32 = arith.constant 0 : i32
    %c0_i32_0 = arith.constant 0 : i32
    return %arg0, %c0_i32 : i32, i32
  }
  func.func @transform_4(%arg0: i32, %arg1: i32, %arg2: i32) -> (i32, i32) {
    %c0_i32 = arith.constant 0 : i32
    %c0_i32_0 = arith.constant 0 : i32
    return %c0_i32, %arg1 : i32, i32
  }
  func.func @transform_5(%arg0: i32, %arg1: i32, %arg2: i32) -> (i32, i32) {
    %c0_i32 = arith.constant 0 : i32
    return %arg0, %arg1 : i32, i32
  }
}

</mosaic_0001>

<bundles_post_ra>
// kernel: _fwd.1
= control target key start
LH: loop header
LB: loop body
LE: loop exit
PB: predicated region body
PF: predicated region fallthrough
CT: control target
= control target key end

     0   :  { %10 = vsyncpa [#allocation4], 0  ;;  %s429_s18 = smov [#allocation3]   ;;  %s522_s0 = inlined_call_operand.vmem [shape: bf16[16,128], index: 0, kind: input, shape index: {}]   ;;  %s523_s1 = inlined_call_operand.vmem [shape: bf16[128,128], index: 1, kind: input, shape index: {}]   ;;  %s524_s2 = inlined_call_operand.hbm [shape: f32[1,128], index: 2, kind: input, shape index: {}]   ;;  %s525_s3 = inlined_call_operand.vmem [shape: bf16[16,128], index: 3, kind: input, shape index: {}]   ;;  %s526_s4 = inlined_call_operand.vmem [shape: bf16[128,128], index: 4, kind: input, shape index: {}]   ;;  %s527_s5 = inlined_call_operand.vmem [shape: bf16[16,128], index: 5, kind: output, shape index: {}]  }
   0x1   :  { %s21_s19 = sshll.u32 %s429_s18, 4  ;;  %s22_s19 = int_to_ptr.vmem [resolvable:$true] %s21_s19 }
   0x2   :  { %s415_s20 = scalar_lea.vmem %s22_s19, 16  ;;  %s419_s21 = scalar_lea.vmem %s22_s19, 32 }
   0x3   :  { %p416_p0 = scmp.ne.s32.totalorder %s22_s19, %s415_s20  ;;  %p420_p1 = scmp.lt.s32.totalorder %s22_s19, %s22_s19 }
   0x4   :  { %p421_p2 = scmp.lt.s32.totalorder %s419_s21, %s415_s20 }
   0x6   :  { %p422_p3 = por %p421_p2, %p420_p1 }
   0x8   :  { %p423_p4 = pnand %p422_p3, %p416_p0 }
   0xa   :  { %426 = shalt.err (!%p423_p4)
}
   0xb   :  { %24 = dma.hbm_to_vmem [thread:$0]  %s524_s2, 16, %s22_s19, [#allocation4]  }
   0xc   :  { %427 = dma.done.wait [#allocation4], 16  }
   0xd   :  { %428 = vsyncadd [#allocation4], 4294967280  ;;  %v430_v0 = vmov 0.0   ;;  %vm431_vm0 = vmmov 0   ;;  %v389_v1 = vld [vmem:[%s523_s1 + $0x38] sm:$0xff]   ;;  %v391_v3 = vld [vmem:[%s523_s1 + $0x30] sm:$0xff]  }
   0xe   :  { %346 = vmatprep.subr.bf16.mxu0 %v430_v0  ;;  %366 = vmatprep.subr.bf16.mxu1 %v430_v0  ;;  %v390_v2 = vld [vmem:[%s526_s4 + $0x38] sm:$0xff]   ;;  %v392_v4 = vld [vmem:[%s526_s4 + $0x30] sm:$0xff]   ;;  %v393_v5 = vld [vmem:[%s523_s1 + $0x28] sm:$0xff]  }
   0xf   :  { %362 = vmatprep.mubr.msk.bf16.mxu0 %vm431_vm0, %v430_v0  ;;  %382 = vmatprep.mubr.msk.bf16.mxu1 %vm431_vm0, %v430_v0  ;;  %v394_v6 = vld [vmem:[%s526_s4 + $0x28] sm:$0xff]   ;;  %v395_v7 = vld [vmem:[%s523_s1 + $0x20] sm:$0xff]   ;;  %v397_v9 = vld [vmem:[%s523_s1 + $0x18] sm:$0xff]  }
  0x10   :  { %347 = vmatpush3.bf16.msra.mxu0 %v389_v1  ;;  %367 = vmatpush3.bf16.msra.mxu1 %v390_v2  ;;  %v396_v8 = vld [vmem:[%s526_s4 + $0x20] sm:$0xff]   ;;  %v398_v10 = vld [vmem:[%s526_s4 + $0x18] sm:$0xff]   ;;  %v399_v11 = vld [vmem:[%s523_s1 + $0x10] sm:$0xff]  }
  0x11   :  { %348 = vmatprep.subr.bf16.mxu0 %v430_v0  ;;  %368 = vmatprep.subr.bf16.mxu1 %v430_v0  ;;  %v400_v12 = vld [vmem:[%s526_s4 + $0x10] sm:$0xff]   ;;  %v401_v13 = vld [vmem:[%s523_s1 + $0x8] sm:$0xff]   ;;  %v403_v15 = vld [vmem:[%s523_s1] sm:$0xff]  }
  0x12   :  { %v402_v14 = vld [vmem:[%s526_s4 + $0x8] sm:$0xff]   ;;  %v404_v16 = vld [vmem:[%s526_s4] sm:$0xff]  }
  0x13   :  { %v405_v17 = vld [vmem:[%s522_s0] sm:$0xff]  }
  0x14   :  { %349 = vmatpush3.bf16.msra.mxu0 %v391_v3  ;;  %369 = vmatpush3.bf16.msra.mxu1 %v392_v4  ;;  %v406_v18 = vld [vmem:[%s525_s3] sm:$0xff]  }
  0x15   :  { %350 = vmatprep.subr.bf16.mxu0 %v430_v0  ;;  %370 = vmatprep.subr.bf16.mxu1 %v430_v0  ;;  %v300_v19 = vld [vmem:[#allocation3] ss:$0 sm:$0xff] }
  0x18   :  { %351 = vmatpush3.bf16.msra.mxu0 %v393_v5  ;;  %371 = vmatpush3.bf16.msra.mxu1 %v394_v6 }
  0x19   :  { %352 = vmatprep.subr.bf16.mxu0 %v430_v0  ;;  %372 = vmatprep.subr.bf16.mxu1 %v430_v0 }
  0x1c   :  { %353 = vmatpush3.bf16.msra.mxu0 %v395_v7  ;;  %373 = vmatpush3.bf16.msra.mxu1 %v396_v8 }
  0x1d   :  { %354 = vmatprep.subr.bf16.mxu0 %v430_v0  ;;  %374 = vmatprep.subr.bf16.mxu1 %v430_v0 }
  0x20   :  { %355 = vmatpush3.bf16.msra.mxu0 %v397_v9  ;;  %375 = vmatpush3.bf16.msra.mxu1 %v398_v10 }
  0x21   :  { %356 = vmatprep.subr.bf16.mxu0 %v430_v0  ;;  %376 = vmatprep.subr.bf16.mxu1 %v430_v0 }
  0x24   :  { %357 = vmatpush3.bf16.msra.mxu0 %v399_v11  ;;  %377 = vmatpush3.bf16.msra.mxu1 %v400_v12 }
  0x25   :  { %358 = vmatprep.subr.bf16.mxu0 %v430_v0  ;;  %378 = vmatprep.subr.bf16.mxu1 %v430_v0 }
  0x28   :  { %359 = vmatpush3.bf16.msra.mxu0 %v401_v13  ;;  %379 = vmatpush3.bf16.msra.mxu1 %v402_v14 }
  0x29   :  { %360 = vmatprep.subr.bf16.mxu0 %v430_v0  ;;  %380 = vmatprep.subr.bf16.mxu1 %v430_v0 }
  0x2c   :  { %361 = vmatpush3.bf16.msra.mxu0 %v403_v15  ;;  %381 = vmatpush3.bf16.msra.mxu1 %v404_v16 }
  0x2f   :  { %363 = vmatmul.mubr.bf16.vlgmr.msra.gmra.mxu0 %v405_v17  ;;  %383 = vmatmul.mubr.bf16.vlgmr.msra.gmra.mxu1 %v406_v18 }
  0xef   :  { %v154_v20 = vpop.f32.mrf.mxu0  ;;  %v274_v21 = vpop.f32.mrf.mxu1 }
  0xf0   :  { %v161_v23 = vadd.f32 %v300_v19, %v154_v20 }
  0xf1   :  { %v364_v22 = vpop.f32.mrf.mxu0  ;;  %v384_v24 = vpop.f32.mrf.mxu1 }
  0xf2   :  { %v283_v29 = vadd.f32 %v274_v21, %v161_v23 }
  0xf3   :  { %v157_v25 = vpop.f32.mrf.mxu0  ;;  %v277_v27 = vpop.f32.mrf.mxu1 }
  0xf4   :  { %v162_v26 = vadd.f32 %v300_v19, %v157_v25 }
  0xf5   :  { %v365_v28 = vpop.f32.mrf.mxu0  ;;  %v385_v31 = vpop.f32.mrf.mxu1 }
  0xf6   :  { %v284_v30 = vadd.f32 %v277_v27, %v162_v26 }
  0xf8   :  { %v326_v32 = vpack.c.bf16 %v284_v30, %v283_v29 }
  0xfa   :  { %327 = vst [vmem:[%s527_s5] sm:$0xff] %v326_v32  }
  0xfb   :  { %299 = vsyncpa [#allocation4], 1 }

</bundles_post_ra>
